<compile_context>
chip_gen: v7x
topology: tpu7x:2x2x1
jax: 0.10.0
libtpu: 0.0.40
codegen_flags: <defaults>
</compile_context>

<pallas_src>
import functools

import jax
import jax.numpy as jnp
from jax.experimental import pallas as pl
from jax.experimental.pallas import tpu as pltpu

_OUT_LANES = 128  # lane-dense output block; real result lives in lane 0.


def _fused_mlp_kernel(*refs, num_hidden, negative_slope, compute_dtype):
    """Whole MLP on one batch tile.

    refs = (x_ref,
            w0, b0, w1, b1, ..., w_{num_hidden-1}, b_{num_hidden-1},
            w_last_row, b_last,
            o_ref)
    """
    x_ref = refs[0]
    o_ref = refs[-1]
    layer_refs = refs[1:-1]

    highest = (None if compute_dtype == jnp.bfloat16
               else jax.lax.Precision.HIGHEST)

    y = x_ref[...].astype(compute_dtype)
    # Hidden layers: MXU matmul (f32 accumulate) + f32 bias + f32 LeakyReLU.
    for l in range(num_hidden):
        w = layer_refs[2 * l][...]          # (in, H) compute_dtype
        b = layer_refs[2 * l + 1][...]      # (1, H)  f32
        y = jnp.dot(y, w, preferred_element_type=jnp.float32,
                    precision=highest)
        y = y + b
        y = jnp.where(y > 0, y, negative_slope * y)
        y = y.astype(compute_dtype)

    # Final Linear(H -> 1): VPU multiply + cross-lane reduce instead of an
    # MXU pass that would produce a single output column.
    w_last = layer_refs[-2][...].astype(jnp.float32)   # (1, H)
    b_last = layer_refs[-1][...]                       # (1, 1) f32
    d = jnp.sum(y.astype(jnp.float32) * w_last, axis=-1, keepdims=True)
    d = d + b_last                                     # (tm, 1)

    # Lane-dense store; caller slices lane 0.
    o_ref[...] = jnp.broadcast_to(d, o_ref.shape).astype(o_ref.dtype)


def init_pose_all_discriminator_params(key, num_joints, hidden_poseall=1024,
                                       num_layers=2):
    """Deterministic init mirroring nn.Linear's U(-1/sqrt(fan_in), +1/sqrt(fan_in))."""
    dims = [32 * num_joints] + [hidden_poseall] * num_layers + [1]
    params = []
    for fan_in, fan_out in zip(dims[:-1], dims[1:]):
        key, kw, kb = jax.random.split(key, 3)
        bound = 1.0 / (fan_in ** 0.5)
        w = jax.random.uniform(kw, (fan_in, fan_out), jnp.float32, -bound, bound)
        b = jax.random.uniform(kb, (fan_out,), jnp.float32, -bound, bound)
        params.append((w, b))
    return params


def pose_all_discriminator_forward(params, comm_features, *, tm=None,
                                   use_bf16=True):
    """Forward pass matching PoseAllDiscriminator.forward, fused into one kernel.

    params: list of (W, b) with W shaped (in_features, out_features); the last
            entry is the (H, 1) final projection.
    comm_features: (B, num_joints, 32) or (B, 32*num_joints).
    """
    B = comm_features.shape[0]
    x = comm_features.reshape(B, -1).astype(jnp.float32)  # .contiguous().view(B, -1)
    F_in = x.shape[1]

    n_layers = len(params)
    num_hidden = n_layers - 1
    compute_dtype = jnp.bfloat16 if use_bf16 else jnp.float32

    # Batch tile: fill the MXU (128 rows) when the batch allows, otherwise a
    # single 8-row-aligned tile. Pad once, slice once.
    if tm is None:
        tm = 128 if B >= 128 else max(8, ((B + 7) // 8) * 8)
    Bp = ((B + tm - 1) // tm) * tm
    if Bp != B:
        x = jnp.pad(x, ((0, Bp - B), (0, 0)))

    # Assemble kernel operands: activations + all weights/biases (full-extent,
    # constant index_map => DMA'd once and resident in VMEM for the whole grid).
    operands = [x]
    in_specs = [pl.BlockSpec((tm, F_in), lambda i: (i, 0))]
    for idx, (w, b) in enumerate(params):
        if idx < num_hidden:
            w_arr = w.astype(compute_dtype)                    # (in, H)
            b_arr = b.reshape(1, -1).astype(jnp.float32)       # (1, H)
        else:
            w_arr = w.reshape(-1).reshape(1, -1).astype(compute_dtype)  # (1, H)
            b_arr = b.reshape(1, 1).astype(jnp.float32)                 # (1, 1)
        operands.append(w_arr)
        operands.append(b_arr)
        in_specs.append(pl.BlockSpec(w_arr.shape, lambda i: (0, 0)))
        in_specs.append(pl.BlockSpec(b_arr.shape, lambda i: (0, 0)))

    kernel = functools.partial(
        _fused_mlp_kernel,
        num_hidden=num_hidden,
        negative_slope=0.2,
        compute_dtype=compute_dtype,
    )

    # TODO(synk): if hidden_poseall is ever raised to >=2048, tile the weight
    # BlockSpecs over K/N (and raise vmem_limit_bytes) instead of full-extent
    # blocks so the resident-weight footprint fits v7x/v5e scoped VMEM.
    out = pl.pallas_call(
        kernel,
        out_shape=jax.ShapeDtypeStruct((Bp, _OUT_LANES), jnp.float32),
        grid=(Bp // tm,),
        in_specs=in_specs,
        out_specs=pl.BlockSpec((tm, _OUT_LANES), lambda i: (i, 0)),
        compiler_params=pltpu.CompilerParams(
            dimension_semantics=("parallel",)),
    )(*operands)

    return out[:B, :1]  # (B, 1)


if __name__ == "__main__":
    # Small, module-consistent shapes: num_joints=4 -> in_features=128,
    # hidden_poseall=32, num_layers=2, batch=2.
    num_joints = 4
    hidden_poseall = 32
    num_layers = 2
    batch = 2

    key = jax.random.PRNGKey(0)
    k_params, k_x = jax.random.split(key)

    params = init_pose_all_discriminator_params(
        k_params, num_joints, hidden_poseall, num_layers)

    # comm_features: (B, num_joints, 32) -> flattened to (B, 32*num_joints)
    comm_features = jax.random.normal(k_x, (batch, num_joints, 32), jnp.float32)

    d_all_pose = pose_all_discriminator_forward(params, comm_features)
    d_all_pose = jax.block_until_ready(d_all_pose)

    assert d_all_pose.shape == (batch, 1), d_all_pose.shape
    assert d_all_pose.dtype == jnp.float32

    # Sanity check against a plain-JAX reference (bf16 matmul tolerance).
    x_ref = comm_features.reshape(batch, -1)
    for i, (w, b) in enumerate(params):
        x_ref = x_ref @ w + b
        if i < len(params) - 1:
            x_ref = jnp.where(x_ref > 0, x_ref, 0.2 * x_ref)
    assert jnp.allclose(d_all_pose, x_ref, atol=3e-2, rtol=3e-2), (
        d_all_pose, x_ref)

    print("KERNEL_OK")
</pallas_src>

<mosaic_0001>
module attributes {stable_mosaic.version = 11 : i64} {
  func.func @_fused_mlp_kernel(%arg0: i32, %arg1: memref<8x128xf32, #tpu.memory_space<vmem>>, %arg2: memref<128x32xbf16, #tpu.memory_space<vmem>>, %arg3: memref<1x32xf32, #tpu.memory_space<vmem>>, %arg4: memref<32x32xbf16, #tpu.memory_space<vmem>>, %arg5: memref<1x32xf32, #tpu.memory_space<vmem>>, %arg6: memref<1x32xbf16, #tpu.memory_space<vmem>>, %arg7: memref<1x1xf32, #tpu.memory_space<vmem>>, %arg8: memref<8x128xf32, #tpu.memory_space<vmem>>) attributes {dimension_semantics = [#tpu.dimension_semantics<parallel>], iteration_bounds = array<i64: 1>, scalar_prefetch = 0 : i64, scratch_operands = 0 : i64, tpu.core_type = #tpu.core_type<tc>, window_params = [{transform_indices = @transform_0, window_bounds = array<i64: 8, 128>}, {pipeline_mode = #tpu.pipeline_mode<synchronous>, transform_indices = @transform_1, window_bounds = array<i64: 128, 32>}, {pipeline_mode = #tpu.pipeline_mode<synchronous>, transform_indices = @transform_2, window_bounds = array<i64: 1, 32>}, {pipeline_mode = #tpu.pipeline_mode<synchronous>, transform_indices = @transform_3, window_bounds = array<i64: 32, 32>}, {pipeline_mode = #tpu.pipeline_mode<synchronous>, transform_indices = @transform_4, window_bounds = array<i64: 1, 32>}, {pipeline_mode = #tpu.pipeline_mode<synchronous>, transform_indices = @transform_5, window_bounds = array<i64: 1, 32>}, {pipeline_mode = #tpu.pipeline_mode<synchronous>, transform_indices = @transform_6, window_bounds = array<i64: 1, 1>}, {transform_indices = @transform_7, window_bounds = array<i64: 8, 128>}]} {
    %c0 = arith.constant 0 : index
    %c0_0 = arith.constant 0 : index
    %0 = vector.load %arg1[%c0, %c0_0] : memref<8x128xf32, #tpu.memory_space<vmem>>, vector<8x128xf32>
    %1 = arith.truncf %0 : vector<8x128xf32> to vector<8x128xbf16>
    %c0_1 = arith.constant 0 : index
    %c0_2 = arith.constant 0 : index
    %2 = vector.load %arg2[%c0_1, %c0_2] : memref<128x32xbf16, #tpu.memory_space<vmem>>, vector<128x32xbf16>
    %c0_3 = arith.constant 0 : index
    %c0_4 = arith.constant 0 : index
    %3 = vector.load %arg3[%c0_3, %c0_4] : memref<1x32xf32, #tpu.memory_space<vmem>>, vector<1x32xf32>
    %cst = arith.constant dense<0.000000e+00> : vector<8x32xf32>
    %4 = tpu.matmul %1, %2, %cst {dimension_numbers = #tpu.dot_dimension_numbers<[1], [0], [0], [1], [0, 0, 1, 1], [], []>} : vector<8x128xbf16>, vector<128x32xbf16>, vector<8x32xf32> -> vector<8x32xf32>
    %5 = vector.broadcast %3 : vector<1x32xf32> to vector<8x32xf32>
    %6 = arith.addf %4, %5 : vector<8x32xf32>
    %cst_5 = arith.constant 0.000000e+00 : f32
    %7 = vector.broadcast %cst_5 : f32 to vector<8x32xf32>
    %8 = arith.cmpf ogt, %6, %7 : vector<8x32xf32>
    %cst_6 = arith.constant 2.000000e-01 : f32
    %9 = vector.broadcast %cst_6 : f32 to vector<8x32xf32>
    %10 = arith.mulf %9, %6 : vector<8x32xf32>
    %11 = arith.select %8, %6, %10 : vector<8x32xi1>, vector<8x32xf32>
    %12 = arith.truncf %11 : vector<8x32xf32> to vector<8x32xbf16>
    %c0_7 = arith.constant 0 : index
    %c0_8 = arith.constant 0 : index
    %13 = vector.load %arg4[%c0_7, %c0_8] : memref<32x32xbf16, #tpu.memory_space<vmem>>, vector<32x32xbf16>
    %c0_9 = arith.constant 0 : index
    %c0_10 = arith.constant 0 : index
    %14 = vector.load %arg5[%c0_9, %c0_10] : memref<1x32xf32, #tpu.memory_space<vmem>>, vector<1x32xf32>
    %cst_11 = arith.constant dense<0.000000e+00> : vector<8x32xf32>
    %15 = tpu.matmul %12, %13, %cst_11 {dimension_numbers = #tpu.dot_dimension_numbers<[1], [0], [0], [1], [0, 0, 1, 1], [], []>} : vector<8x32xbf16>, vector<32x32xbf16>, vector<8x32xf32> -> vector<8x32xf32>
    %16 = vector.broadcast %14 : vector<1x32xf32> to vector<8x32xf32>
    %17 = arith.addf %15, %16 : vector<8x32xf32>
    %cst_12 = arith.constant 0.000000e+00 : f32
    %18 = vector.broadcast %cst_12 : f32 to vector<8x32xf32>
    %19 = arith.cmpf ogt, %17, %18 : vector<8x32xf32>
    %cst_13 = arith.constant 2.000000e-01 : f32
    %20 = vector.broadcast %cst_13 : f32 to vector<8x32xf32>
    %21 = arith.mulf %20, %17 : vector<8x32xf32>
    %22 = arith.select %19, %17, %21 : vector<8x32xi1>, vector<8x32xf32>
    %23 = arith.truncf %22 : vector<8x32xf32> to vector<8x32xbf16>
    %c0_14 = arith.constant 0 : index
    %c0_15 = arith.constant 0 : index
    %24 = vector.load %arg6[%c0_14, %c0_15] : memref<1x32xbf16, #tpu.memory_space<vmem>>, vector<1x32xbf16>
    %25 = arith.extf %24 : vector<1x32xbf16> to vector<1x32xf32>
    %c0_16 = arith.constant 0 : index
    %c0_17 = arith.constant 0 : index
    %26 = vector.load %arg7[%c0_16, %c0_17] : memref<1x1xf32, #tpu.memory_space<vmem>>, vector<1x1xf32>
    %27 = arith.extf %23 : vector<8x32xbf16> to vector<8x32xf32>
    %28 = vector.broadcast %25 : vector<1x32xf32> to vector<8x32xf32>
    %29 = arith.mulf %27, %28 : vector<8x32xf32>
    %cst_18 = arith.constant dense<0.000000e+00> : vector<8xf32>
    %30 = vector.multi_reduction <add>, %29, %cst_18 [1] : vector<8x32xf32> to vector<8xf32>
    %31 = vector.shape_cast %30 : vector<8xf32> to vector<8x1xf32>
    %32 = vector.broadcast %26 : vector<1x1xf32> to vector<8x1xf32>
    %33 = arith.addf %31, %32 : vector<8x1xf32>
    %34 = vector.shape_cast %33 : vector<8x1xf32> to vector<8x1xf32>
    %35 = vector.broadcast %34 : vector<8x1xf32> to vector<8x128xf32>
    %c0_19 = arith.constant 0 : index
    %c0_20 = arith.constant 0 : index
    %36 = vector.load %arg8[%c0_19, %c0_20] : memref<8x128xf32, #tpu.memory_space<vmem>>, vector<8x128xf32>
    tpu.vector_store %arg8[%c0_19, %c0_20], %35 {strides = array<i32>} : memref<8x128xf32, #tpu.memory_space<vmem>>, vector<8x128xf32>,
    return
  }
  func.func @transform_0(%arg0: i32) -> (i32, i32) {
    %c0_i32 = arith.constant 0 : i32
    %c0_i32_0 = arith.constant 0 : i32
    return %arg0, %c0_i32 : i32, i32
  }
  func.func @transform_1(%arg0: i32) -> (i32, i32) {
    %c0_i32 = arith.constant 0 : i32
    %c0_i32_0 = arith.constant 0 : i32
    %c0_i32_1 = arith.constant 0 : i32
    return %c0_i32, %c0_i32_0 : i32, i32
  }
  func.func @transform_2(%arg0: i32) -> (i32, i32) {
    %c0_i32 = arith.constant 0 : i32
    %c0_i32_0 = arith.constant 0 : i32
    %c0_i32_1 = arith.constant 0 : i32
    return %c0_i32, %c0_i32_0 : i32, i32
  }
  func.func @transform_3(%arg0: i32) -> (i32, i32) {
    %c0_i32 = arith.constant 0 : i32
    %c0_i32_0 = arith.constant 0 : i32
    %c0_i32_1 = arith.constant 0 : i32
    return %c0_i32, %c0_i32_0 : i32, i32
  }
  func.func @transform_4(%arg0: i32) -> (i32, i32) {
    %c0_i32 = arith.constant 0 : i32
    %c0_i32_0 = arith.constant 0 : i32
    %c0_i32_1 = arith.constant 0 : i32
    return %c0_i32, %c0_i32_0 : i32, i32
  }
  func.func @transform_5(%arg0: i32) -> (i32, i32) {
    %c0_i32 = arith.constant 0 : i32
    %c0_i32_0 = arith.constant 0 : i32
    %c0_i32_1 = arith.constant 0 : i32
    return %c0_i32, %c0_i32_0 : i32, i32
  }
  func.func @transform_6(%arg0: i32) -> (i32, i32) {
    %c0_i32 = arith.constant 0 : i32
    %c0_i32_0 = arith.constant 0 : i32
    %c0_i32_1 = arith.constant 0 : i32
    return %c0_i32, %c0_i32_0 : i32, i32
  }
  func.func @transform_7(%arg0: i32) -> (i32, i32) {
    %c0_i32 = arith.constant 0 : i32
    %c0_i32_0 = arith.constant 0 : i32
    return %arg0, %c0_i32 : i32, i32
  }
}

</mosaic_0001>

<bundles_post_ra>
// kernel: tpu_custom_call.1
= control target key start
LH: loop header
LB: loop body
LE: loop exit
PB: predicated region body
PF: predicated region fallthrough
CT: control target
= control target key end

     0   :  { %s453_s0 = inlined_call_operand.vmem [shape: f32[8,128], index: 0, kind: input, shape index: {}]   ;;  %s454_s1 = inlined_call_operand.vmem [shape: bf16[128,32], index: 1, kind: input, shape index: {}]   ;;  %s455_s2 = inlined_call_operand.vmem [shape: f32[1,32], index: 2, kind: input, shape index: {}]   ;;  %s456_s3 = inlined_call_operand.vmem [shape: bf16[32,32], index: 3, kind: input, shape index: {}]   ;;  %s457_s4 = inlined_call_operand.vmem [shape: f32[1,32], index: 4, kind: input, shape index: {}]   ;;  %s458_s5 = inlined_call_operand.vmem [shape: bf16[1,32], index: 5, kind: input, shape index: {}]   ;;  %s459_s6 = inlined_call_operand.<no memory space> [shape: f32[1,1], index: 6, kind: input, shape index: {}]   ;;  %s460_s7 = inlined_call_operand.hbm [shape: f32[8,128], index: 7, kind: output, shape index: {}]  }
   0x1   :  { %v12_v0 = vstv %s459_s6 }
   0x2   :  { %13 = vst [vmem:[#allocation2] sm:$0x1] %v12_v0 }
   0x3   :  { %v316_v1 = vld [vmem:[%s454_s1] sm:$0xff]   ;;  %v350_v2 = vmov 0.0   ;;  %v317_v3 = vld [vmem:[%s454_s1 + $0x8] sm:$0xff]   ;;  %vm351_vm0 = vmmov 0   ;;  %v318_v4 = vld [vmem:[%s454_s1 + $0x10] sm:$0xff]  }
   0x4   :  { %283 = vmatprep.subr.bf16.mxu0 %v350_v2  ;;  %303 = vmatprep.subr.bf16.mxu1 %v350_v2  ;;  %v319_v5 = vld [vmem:[%s454_s1 + $0x18] sm:$0xff]  }
   0x5   :  { %284 = vmatpush3.bf16.msra.mxu0 %v316_v1  ;;  %299 = vmatprep.mubr.msk.bf16.mxu0 %vm351_vm0, %v350_v2 }
   0x6   :  { %285 = vmatprep.subr.bf16.mxu0 %v350_v2  ;;  %307 = vmatprep.mubr.msk.bf16.mxu1 %vm351_vm0, %v350_v2 }
   0x9   :  { %286 = vmatpush3.bf16.msra.mxu0 %v317_v3 }
   0xa   :  { %287 = vmatprep.subr.bf16.mxu0 %v350_v2 }
   0xd   :  { %288 = vmatpush3.bf16.msra.mxu0 %v318_v4 }
   0xe   :  { %14 = vsyncpa [#allocation4], 0  ;;  %289 = vmatprep.subr.bf16.mxu0 %v350_v2  ;;  %v320_v6 = vld [vmem:[%s454_s1 + $0x20] sm:$0xff]   ;;  %v321_v7 = vld [vmem:[%s454_s1 + $0x28] sm:$0xff]   ;;  %vm170_vm2 = vcmask 261120   ;;  %v222_v23 = vlaneseq  ;;  %v352_v41 = vmov 0  }
   0xf   :  { %v322_v8 = vld [vmem:[%s454_s1 + $0x30] sm:$0xff]   ;;  %v323_v9 = vld [vmem:[%s454_s1 + $0x38] sm:$0xff]   ;;  %v30_v10 = vld [vmem:[%s453_s0] sm:$0xff]  ;;  %315 = vset.pattern.permute.xlu0 %v352_v41 }
  0x10   :  { %v31_v11 = vpack.c.bf16 %v30_v10, %v30_v10  ;;  %v324_v12 = vld [vmem:[%s456_s3] sm:$0xff]   ;;  %v325_v13 = vld [vmem:[%s456_s3 + $0x8] sm:$0xff]   ;;  %v223_v25 = vshrl.u32 %v222_v23, 7 }
  0x11   :  { %290 = vmatpush3.bf16.msra.mxu0 %v319_v5  ;;  %304 = vmatpush3.bf16.msra.mxu1 %v324_v12  ;;  %v257_v14 = vld [vmem:[%s455_s2] ss:$0 sm:$0xff] }
  0x12   :  { %291 = vmatprep.subr.bf16.mxu0 %v350_v2  ;;  %305 = vmatprep.subr.bf16.mxu1 %v350_v2  ;;  %v266_v24 = vld [vmem:[%s457_s4] ss:$0 sm:$0xff]  ;;  %v224_v32 = vsub.s32 0, %v223_v25  ;;  %s353_s4 = smov [#allocation3]  }
  0x13   :  { %v218_v26 = vld [vmem:[%s458_s5] sm:$0x1]  ;;  %s249_s5 = sshll.u32 %s353_s4, 4  ;;  %s250_s5 = int_to_ptr.vmem [resolvable:$true] %s249_s5 }
  0x14   :  { %v219_v31 = vunpack.c.l.bf16 %v218_v26  ;;  %v270_v42 = vld [vmem:[#allocation2] ss:$0 sm:$0xff]  ;;  %s326_s26 = scalar_lea.vmem %s250_s5, 128  ;;  %p331_p1 = scmp.lt.s32.totalorder %s250_s5, %s250_s5 }
  0x15   :  { %292 = vmatpush3.bf16.msra.mxu0 %v320_v6  ;;  %306 = vmatpush3.bf16.msra.mxu1 %v325_v13  ;;  %p327_p0 = scmp.ne.s32.totalorder %s250_s5, %s326_s26  ;;  %p332_p2 = scmp.lt.s32.totalorder %s326_s26, %s326_s26 }
  0x16   :  { %293 = vmatprep.subr.bf16.mxu0 %v350_v2  ;;  %v225_v37 = vrot.slane %v219_v31, %v224_v32 }
  0x17   :  { %p333_p3 = por %p332_p2, %p331_p1 }
  0x19   :  { %294 = vmatpush3.bf16.msra.mxu0 %v321_v7  ;;  %p334_p4 = pnand %p333_p3, %p327_p0 }
  0x1a   :  { %295 = vmatprep.subr.bf16.mxu0 %v350_v2 }
  0x1d   :  { %296 = vmatpush3.bf16.msra.mxu0 %v322_v8 }
  0x1e   :  { %297 = vmatprep.subr.bf16.mxu0 %v350_v2 }
  0x21   :  { %298 = vmatpush3.bf16.msra.mxu0 %v323_v9 }
  0x24   :  { %300 = vmatmul.mubr.bf16.vlgmr.msra.gmra.mrb[0].mxu0 %v31_v11 }
  0xf7   :  { %v137_v15 = vpop.f32.mrb[0].mxu0 }
  0xf8   :  { %v138_v16 = vadd.f32 %v257_v14, %v137_v15  ;;  %v301_v17 = vpop.f32.mrb[1].mxu0 }
  0xf9   :  { %v140_v18 = vpop.f32.mrb[2].mxu0 }
  0xfa   :  { %vm143_vm1 = vcmp.gt.f32.partialorder %v138_v16, 0.0  ;;  %v144_v19 = vmul.f32 0.2, %v138_v16  ;;  %v302_v20 = vpop.f32.mrb[3].mxu0 }
  0xfc   :  { %v145_v21 = vsel %vm143_vm1, %v138_v16, %v144_v19 }
  0xfd   :  { %v146_v22 = vpack.c.bf16 %v145_v21, %v145_v21 }
  0xff   :  { %308 = vmatmul.mubr.msk.bf16.vlgmr.msra.gmra.mrb[0].mxu1 %vm170_vm2, %v146_v22 }
 0x1d2   :  { %v208_v27 = vpop.f32.mrb[0].mxu1 }
 0x1d3   :  { %v209_v28 = vadd.f32 %v266_v24, %v208_v27  ;;  %v309_v29 = vpop.f32.mrb[1].mxu1 }
 0x1d4   :  { %v211_v30 = vpop.f32.mrb[2].mxu1 }
 0x1d5   :  { %vm214_vm3 = vcmp.gt.f32.partialorder %v209_v28, 0.0  ;;  %v215_v33 = vmul.f32 0.2, %v209_v28  ;;  %v310_v34 = vpop.f32.mrb[3].mxu1 }
 0x1d7   :  { %v216_v35 = vsel %vm214_vm3, %v209_v28, %v215_v33 }
 0x1d8   :  { %v217_v36 = vpack.c.bf16 %v216_v35, %v216_v35 }
 0x1da   :  { %v221_v38 = vunpack.c.l.bf16 %v217_v36 }
 0x1dc   :  { %v226_v39 = vmul.f32 %v225_v37, %v221_v38 }
 0x1de   :  { %v227_v40 = vsel %vm170_vm2, %v226_v39, 0.0 }
 0x1df   :  { %228 = vadd.xlane.f32.xlu0 %v227_v40 }
 0x26c   :  { %v229_v43 = vpop.xlane.xlu0 %228 }
 0x26d   :  { %v236_v44 = vadd.f32 %v270_v42, %v229_v43 }
 0x26f   :  { %239 = vperm.xlu0 %315, %v236_v44  }
 0x2ee   :  { %v240_v45 = vpop.permute.xlu0 %239 }
 0x2ef   :  { %242 = vst [vmem:[#allocation3] sm:$0xff] %v240_v45 }
 0x2f0   :  { %337 = shalt.err (!%p334_p4)
}
 0x2f1   :  { %s338_s29 = scalar_lea.hbm %s460_s7, 128 }
 0x2f2   :  { %p339_p5 = scmp.ne.s32.totalorder %s460_s7, %s338_s29  ;;  %p342_p6 = scmp.lt.u32.totalorder %s338_s29, %s460_s7 }
 0x2f4   :  { %p344_p7 = pnand %p342_p6, %p339_p5 }
 0x2f6   :  { %347 = shalt.err (!%p344_p7)
}
 0x2f7   :  { %252 = dma.vmem_to_hbm [thread:$0]  %s250_s5, 128, %s460_s7, [#allocation4]  }
 0x2f8   :  { %348 = dma.done.wait [#allocation4], 128  }
 0x2f9   :  { %349 = vsyncadd [#allocation4], 4294967168 }
 0x2fa   :  { %256 = vsyncpa [#allocation4], 1 }

</bundles_post_ra>
